<compile_context>
chip_gen: v6e
topology: v6e:2x2x1
jax: 0.10.0
libtpu: 0.0.40
codegen_flags: <defaults>
</compile_context>

<pallas_src>
import functools

import numpy as np
import jax
import jax.numpy as jnp
from jax.experimental import pallas as pl
from jax.experimental.pallas import tpu as pltpu


# ----------------------------------------------------------------------------
# Pallas kernels.
# ----------------------------------------------------------------------------
def _pool_conv_kernel(x_ref, pt_ref, w_ref, b_ref, m_ref, z_ref, acc_ref, *,
                      hw, hwt, mask_ragged):
    # x_ref  : (1, C, hwt)   NCHW spatial tile of x
    # pt_ref : (hwt, S)      kron-combined adaptive-avg-pool matrix tile (P^T)
    # w_ref  : (4R, C)       stacked 1x1-conv weights (BN scale folded in)
    # b_ref  : (4R, 1)       stacked folded BN biases
    # m_ref  : (4R, S)       0/1 block mask (bin's channels x bin's cells)
    # z_ref  : (1, 4R, S)    block-structured pooled+conv+BN+ReLU activations
    # acc_ref: (C, S) f32    pooled accumulator across spatial tiles
    t = pl.program_id(1)

    @pl.when(t == 0)
    def _init():
        acc_ref[...] = jnp.zeros_like(acc_ref)

    xt = x_ref[0]                                   # (C, hwt)
    if mask_ragged:
        # Last tile may extend past HW: zero the out-of-range lanes so the
        # (zero-padded) Pt rows they hit contribute exactly 0 to the pool.
        lane = jax.lax.broadcasted_iota(jnp.int32, xt.shape, 1)
        xt = jnp.where(t * hwt + lane < hw, xt, jnp.zeros_like(xt))

    # Partial adaptive average pool for this spatial tile (f32 accumulation).
    acc_ref[...] += jnp.dot(xt, pt_ref[...], preferred_element_type=jnp.float32)

    @pl.when(t == pl.num_programs(1) - 1)
    def _finalize():
        # 1x1 conv (+folded BN) for all bins at once, bias add, ReLU, then the
        # 0/1 block mask keeps only each bin's (R x bin^2) block so pass 2 can
        # upsample all bins with a single GEMM.
        z = jnp.dot(w_ref[...], acc_ref[...].astype(w_ref.dtype),
                    preferred_element_type=jnp.float32)
        z = jnp.maximum(z + b_ref[...], 0.0) * m_ref[...]
        z_ref[0] = z.astype(z_ref.dtype)


def _upsample_kernel(z_ref, ut_ref, o_ref):
    # z_ref : (1, 4R, S)    block-structured branch activations (f32)
    # ut_ref: (S, hwt)      kron-combined bilinear upsample matrix tile (U^T)
    # o_ref : (1, 4R, hwt)  branch channels of the output (lane-dense store)
    up = jnp.dot(z_ref[0].astype(ut_ref.dtype), ut_ref[...],
                 preferred_element_type=jnp.float32)
    o_ref[0] = up.astype(o_ref.dtype)


# ----------------------------------------------------------------------------
# Host-side helpers: pooling / upsampling matrices, deterministic params.
# ----------------------------------------------------------------------------
def adaptive_pool_matrix(out_size, in_size):
    """Row a averages input elements [floor(a*in/out), ceil((a+1)*in/out))."""
    m = np.zeros((out_size, in_size), np.float32)
    for a in range(out_size):
        start = (a * in_size) // out_size
        end = -((-(a + 1) * in_size) // out_size)  # ceil division
        m[a, start:end] = 1.0 / (end - start)
    return m


def bilinear_matrix(out_size, in_size):
    """Bilinear interpolation matrix, align_corners=True (F.interpolate)."""
    m = np.zeros((out_size, in_size), np.float32)
    if in_size == 1:
        m[:, 0] = 1.0
        return m
    for i in range(out_size):
        src = 0.0 if out_size == 1 else i * (in_size - 1) / (out_size - 1)
        i0 = min(int(np.floor(src)), in_size - 1)
        i1 = min(i0 + 1, in_size - 1)
        frac = src - i0
        m[i, i0] += 1.0 - frac
        m[i, i1] += frac
    return m


def _rup(x, m):
    return ((x + m - 1) // m) * m


class PPMPallas:
    def __init__(self, in_dim, reduction_dim, bins=(1, 2, 3, 6), key=None,
                 hw_tile=None):
        self.in_dim = in_dim
        self.R = reduction_dim
        self.bins = tuple(bins)
        self.nb = len(self.bins)
        self.S = sum(s * s for s in self.bins)
        self.hw_tile = hw_tile
        eps = 1e-5
        key = jax.random.PRNGKey(42) if key is None else key

        self.per_bin = []   # (w_fold (R,C), b_fold (R,)) for the JAX reference
        w_rows, b_rows = [], []
        for _ in self.bins:
            key, k1, k2, k3, k4, k5 = jax.random.split(key, 6)
            conv_w = jax.random.normal(k1, (reduction_dim, in_dim), jnp.float32) * 0.1
            gamma = jax.random.uniform(k2, (reduction_dim,), jnp.float32, 0.5, 1.5)
            beta = jax.random.normal(k3, (reduction_dim,), jnp.float32) * 0.1
            run_mean = jax.random.normal(k4, (reduction_dim,), jnp.float32) * 0.1
            run_var = jax.random.uniform(k5, (reduction_dim,), jnp.float32, 0.5, 1.5)
            # Fold BatchNorm (eval mode) into the 1x1 conv.
            scale = gamma / jnp.sqrt(run_var + eps)
            w_fold = conv_w * scale[:, None]           # (R, C)
            b_fold = beta - run_mean * scale           # (R,)
            self.per_bin.append((w_fold, b_fold))
            w_rows.append(w_fold)
            b_rows.append(b_fold)

        self.w_big = jnp.concatenate(w_rows, axis=0)          # (4R, C)
        self.b_col = jnp.concatenate(b_rows)[:, None]          # (4R, 1) f32

        # 0/1 block mask: channels of bin b only keep bin b's pooled cells.
        mask = np.zeros((self.nb * reduction_dim, self.S), np.float32)
        off = 0
        for bi, s in enumerate(self.bins):
            mask[bi * reduction_dim:(bi + 1) * reduction_dim,
                 off:off + s * s] = 1.0
            off += s * s
        self.mask = jnp.asarray(mask)                          # (4R, S) f32
        self._mat_cache = {}

    # -- pool / upsample matrices, zero-padded along HW to a tile multiple ----
    def _spatial_mats(self, H, W, hw_pad):
        key = (H, W, hw_pad)
        if key in self._mat_cache:
            return self._mat_cache[key]
        HW = H * W
        p_blocks, u_blocks = [], []
        for s in self.bins:
            ph = adaptive_pool_matrix(s, H)     # (s, H)
            pw = adaptive_pool_matrix(s, W)     # (s, W)
            uh = bilinear_matrix(H, s)          # (H, s)
            uw = bilinear_matrix(W, s)          # (W, s)
            p_blocks.append(np.kron(ph, pw))    # (s*s, H*W)
            u_blocks.append(np.kron(uh, uw))    # (H*W, s*s)
        P = np.concatenate(p_blocks, axis=0)    # (S, HW)
        U = np.concatenate(u_blocks, axis=1)    # (HW, S)
        Pt = np.zeros((hw_pad, self.S), np.float32)
        Pt[:HW, :] = P.T                        # zero pad rows: pool unchanged
        Ut = np.zeros((self.S, hw_pad), np.float32)
        Ut[:, :HW] = U.T                        # pad cols: throwaway lanes
        mats = (jnp.asarray(Pt), jnp.asarray(Ut))
        self._mat_cache[key] = mats
        return mats

    # -- VMEM-aware spatial-tile selection ------------------------------------
    def _vmem_estimate(self, hwt, C, nbR, isz):
        S_l = _rup(self.S, 128)   # lane padding of the S axis in VMEM
        S_s = _rup(self.S, 8)     # sublane padding of the S axis in VMEM
        p1 = (2 * _rup(C, 8) * hwt * isz          # x block (double buffered)
              + 2 * hwt * S_l * isz               # Pt block
              + _rup(nbR, 8) * _rup(C, 128) * isz  # W (single buffered)
              + _rup(nbR, 8) * 128 * 4            # bias
              + _rup(nbR, 8) * S_l * 4            # mask
              + 2 * _rup(nbR, 8) * S_l * 4        # z output block
              + _rup(C, 8) * S_l * 4)             # acc scratch
        p2 = (2 * _rup(nbR, 8) * S_l * 4          # z block
              + 2 * S_s * hwt * isz               # Ut block
              + 2 * _rup(nbR, 8) * hwt * isz)     # output block
        return max(p1, p2)

    def _pick_hw_tile(self, HW, C, nbR, isz):
        if self.hw_tile is not None:
            hwt = self.hw_tile
            if not (hwt == HW or (0 < hwt <= HW and hwt % 128 == 0)):
                raise ValueError(
                    f"hw_tile={hwt} must equal H*W={HW} or be a positive "
                    f"multiple of 128 that is <= H*W")
            return hwt
        if HW <= 128:
            return HW
        budget = 40 * 1024 * 1024   # conservative: fits v7x's 64 MiB VMEM
        for cand in (2048, 1024, 512, 256, 128):
            if cand <= HW and self._vmem_estimate(cand, C, nbR, isz) <= budget:
                return cand
        return 128

    # -- forward ---------------------------------------------------------------
    def __call__(self, x):
        N, C, H, W = x.shape
        assert C == self.in_dim
        HW = H * W
        nbR = self.nb * self.R
        S = self.S
        dt = x.dtype
        isz = int(jnp.dtype(dt).itemsize)

        hwt = self._pick_hw_tile(HW, C, nbR, isz)
        T = -(-HW // hwt)                 # ceil div
        hw_pad = T * hwt
        mask_ragged = (hw_pad != HW)

        Pt, Ut = self._spatial_mats(H, W, hw_pad)
        Pt = Pt.astype(dt)
        Ut = Ut.astype(dt)
        w_big = self.w_big.astype(dt)

        est = self._vmem_estimate(hwt, C, nbR, isz)
        vmem_limit = min(max(48 * 1024 * 1024, int(est * 1.25)),
                         128 * 1024 * 1024)

        # Free reshape: (N, C, H, W) -> (N, C, HW). No transposes anywhere.
        x_flat = x.reshape(N, C, HW)

        # ---- Pass 1: adaptive pool + 1x1 conv + folded BN + ReLU (all bins).
        z = pl.pallas_call(
            functools.partial(_pool_conv_kernel, hw=HW, hwt=hwt,
                              mask_ragged=mask_ragged),
            out_shape=jax.ShapeDtypeStruct((N, nbR, S), jnp.float32),
            grid=(N, T),
            in_specs=[
                pl.BlockSpec((1, C, hwt), lambda n, t: (n, 0, t)),
                pl.BlockSpec((hwt, S), lambda n, t: (t, 0)),
                pl.BlockSpec((nbR, C), lambda n, t: (0, 0),
                             pipeline_mode=pl.Buffered(1)),
                pl.BlockSpec((nbR, 1), lambda n, t: (0, 0),
                             pipeline_mode=pl.Buffered(1)),
                pl.BlockSpec((nbR, S), lambda n, t: (0, 0),
                             pipeline_mode=pl.Buffered(1)),
            ],
            out_specs=pl.BlockSpec((1, nbR, S), lambda n, t: (n, 0, 0)),
            scratch_shapes=[pltpu.VMEM((C, S), jnp.float32)],
            compiler_params=pltpu.CompilerParams(
                dimension_semantics=("parallel", "arbitrary"),
                vmem_limit_bytes=vmem_limit),
            cost_estimate=pl.CostEstimate(
                flops=2 * N * (HW * C * S + C * nbR * S),
                transcendentals=0,
                bytes_accessed=(N * C * HW * isz + hw_pad * S * isz
                                + nbR * C * isz + N * nbR * S * 4)),
        )(x_flat, Pt, w_big, self.b_col, self.mask)

        # ---- Pass 2: bilinear upsample of all bins; branch channels only
        # (x is NOT re-read here).
        branches = pl.pallas_call(
            _upsample_kernel,
            out_shape=jax.ShapeDtypeStruct((N, nbR, HW), dt),
            grid=(N, T),
            in_specs=[
                pl.BlockSpec((1, nbR, S), lambda n, t: (n, 0, 0)),
                pl.BlockSpec((S, hwt), lambda n, t: (0, t)),
            ],
            out_specs=pl.BlockSpec((1, nbR, hwt), lambda n, t: (n, 0, t)),
            compiler_params=pltpu.CompilerParams(
                dimension_semantics=("parallel", "parallel"),
                vmem_limit_bytes=vmem_limit),
            cost_estimate=pl.CostEstimate(
                flops=2 * N * HW * S * nbR,
                transcendentals=0,
                bytes_accessed=(N * nbR * S * 4 + S * hw_pad * isz
                                + N * nbR * HW * isz)),
        )(z, Ut)

        # Channel concat in the native NCHW layout: one XLA copy, replaces the
        # previous version's extra x read + masked channel-slab stores.
        return jnp.concatenate([x, branches.reshape(N, nbR, H, W)], axis=1)

    # -- pure-JAX reference (separable form of the same math) ------------------
    def reference(self, x):
        N, C, H, W = x.shape
        outs = [x]
        for (w_fold, b_fold), s in zip(self.per_bin, self.bins):
            ph = jnp.asarray(adaptive_pool_matrix(s, H))
            pw = jnp.asarray(adaptive_pool_matrix(s, W))
            uh = jnp.asarray(bilinear_matrix(H, s))
            uw = jnp.asarray(bilinear_matrix(W, s))
            pooled = jnp.einsum('ah,nchw,bw->ncab', ph, x.astype(jnp.float32), pw)
            z = jnp.einsum('oc,ncab->noab', w_fold, pooled) \
                + b_fold[None, :, None, None]
            z = jnp.maximum(z, 0.0)
            up = jnp.einsum('ia,jb,noab->noij', uh, uw, z)
            outs.append(up.astype(x.dtype))
        return jnp.concatenate(outs, axis=1)


if __name__ == "__main__":
    N, C, H, W = 2, 4, 16, 16
    reduction_dim = 8
    x = jax.random.normal(jax.random.PRNGKey(0), (N, C, H, W), jnp.float32)

    # hw_tile=128 -> 2 spatial tiles, so the accumulator path (pl.when
    # init/finalize over the reduction grid axis) is exercised.
    ppm = PPMPallas(in_dim=C, reduction_dim=reduction_dim, bins=(1, 2, 3, 6),
                    hw_tile=128)
    out = jax.block_until_ready(ppm(x))

    assert out.shape == (N, C + 4 * reduction_dim, H, W), out.shape
    ref = jax.block_until_ready(ppm.reference(x))
    np.testing.assert_allclose(np.asarray(out), np.asarray(ref),
                               rtol=1e-4, atol=1e-4)
    print("KERNEL_OK")
</pallas_src>

<mosaic_0001>
module attributes {stable_mosaic.version = 11 : i64} {
  func.func @_pool_conv_kernel(%arg0: i32, %arg1: i32, %arg2: memref<1x4x128xf32, #tpu.memory_space<vmem>>, %arg3: memref<128x50xf32, #tpu.memory_space<vmem>>, %arg4: memref<32x4xf32, #tpu.memory_space<vmem>>, %arg5: memref<32x1xf32, #tpu.memory_space<vmem>>, %arg6: memref<32x50xf32, #tpu.memory_space<vmem>>, %arg7: memref<1x32x50xf32, #tpu.memory_space<vmem>>, %arg8: memref<4x50xf32, #tpu.memory_space<vmem>>) attributes {dimension_semantics = [#tpu.dimension_semantics<parallel>, #tpu.dimension_semantics<arbitrary>], iteration_bounds = array<i64: 2, 2>, scalar_prefetch = 0 : i64, scratch_operands = 1 : i64, tpu.core_type = #tpu.core_type<tc>, window_params = [{transform_indices = @transform_0, window_bounds = array<i64: 1, 4, 128>}, {transform_indices = @transform_1, window_bounds = array<i64: 128, 50>}, {pipeline_mode = #tpu.pipeline_mode<synchronous>, transform_indices = @transform_2, window_bounds = array<i64: 32, 4>}, {pipeline_mode = #tpu.pipeline_mode<synchronous>, transform_indices = @transform_3, window_bounds = array<i64: 32, 1>}, {pipeline_mode = #tpu.pipeline_mode<synchronous>, transform_indices = @transform_4, window_bounds = array<i64: 32, 50>}, {transform_indices = @transform_5, window_bounds = array<i64: 1, 32, 50>}]} {
    %c0_i32 = arith.constant 0 : i32
    %0 = arith.cmpi eq, %arg1, %c0_i32 : i32
    %1 = arith.extui %0 : i1 to i32
    %c0_i32_0 = arith.constant 0 : i32
    %2 = arith.cmpi ne, %1, %c0_i32_0 : i32
    scf.if %2 {
      %cst_10 = arith.constant 0.000000e+00 : f32
      %13 = vector.broadcast %cst_10 : f32 to vector<4x50xf32>
      %c0_11 = arith.constant 0 : index
      %c0_12 = arith.constant 0 : index
      %14 = vector.load %arg8[%c0_11, %c0_12] : memref<4x50xf32, #tpu.memory_space<vmem>>, vector<4x50xf32>
      tpu.vector_store %arg8[%c0_11, %c0_12], %13 {strides = array<i32>} : memref<4x50xf32, #tpu.memory_space<vmem>>, vector<4x50xf32>,
    } else {
    }
    %c0 = arith.constant 0 : index
    %c0_1 = arith.constant 0 : index
    %c0_2 = arith.constant 0 : index
    %3 = vector.load %arg2[%c0, %c0_1, %c0_2] : memref<1x4x128xf32, #tpu.memory_space<vmem>>, vector<1x4x128xf32>
    %4 = vector.shape_cast %3 : vector<1x4x128xf32> to vector<4x128xf32>
    %c0_3 = arith.constant 0 : index
    %c0_4 = arith.constant 0 : index
    %5 = vector.load %arg8[%c0_3, %c0_4] : memref<4x50xf32, #tpu.memory_space<vmem>>, vector<4x50xf32>
    %c0_5 = arith.constant 0 : index
    %c0_6 = arith.constant 0 : index
    %6 = vector.load %arg3[%c0_5, %c0_6] : memref<128x50xf32, #tpu.memory_space<vmem>>, vector<128x50xf32>
    %cst = arith.constant dense<0.000000e+00> : vector<4x50xf32>
    %7 = tpu.matmul %4, %6, %cst {dimension_numbers = #tpu.dot_dimension_numbers<[1], [0], [0], [1], [0, 0, 1, 1], [], []>} : vector<4x128xf32>, vector<128x50xf32>, vector<4x50xf32> -> vector<4x50xf32>
    %8 = arith.addf %5, %7 : vector<4x50xf32>
    %c0_7 = arith.constant 0 : index
    %c0_8 = arith.constant 0 : index
    %9 = vector.load %arg8[%c0_7, %c0_8] : memref<4x50xf32, #tpu.memory_space<vmem>>, vector<4x50xf32>
    tpu.vector_store %arg8[%c0_7, %c0_8], %8 {strides = array<i32>} : memref<4x50xf32, #tpu.memory_space<vmem>>, vector<4x50xf32>,
    %c1_i32 = arith.constant 1 : i32
    %10 = arith.cmpi eq, %arg1, %c1_i32 : i32
    %11 = arith.extui %10 : i1 to i32
    %c0_i32_9 = arith.constant 0 : i32
    %12 = arith.cmpi ne, %11, %c0_i32_9 : i32
    scf.if %12 {
      %c0_10 = arith.constant 0 : index
      %c0_11 = arith.constant 0 : index
      %13 = vector.load %arg4[%c0_10, %c0_11] : memref<32x4xf32, #tpu.memory_space<vmem>>, vector<32x4xf32>
      %c0_12 = arith.constant 0 : index
      %c0_13 = arith.constant 0 : index
      %14 = vector.load %arg8[%c0_12, %c0_13] : memref<4x50xf32, #tpu.memory_space<vmem>>, vector<4x50xf32>
      %cst_14 = arith.constant dense<0.000000e+00> : vector<32x50xf32>
      %15 = tpu.matmul %13, %14, %cst_14 {dimension_numbers = #tpu.dot_dimension_numbers<[1], [0], [0], [1], [0, 0, 1, 1], [], []>} : vector<32x4xf32>, vector<4x50xf32>, vector<32x50xf32> -> vector<32x50xf32>
      %c0_15 = arith.constant 0 : index
      %c0_16 = arith.constant 0 : index
      %16 = vector.load %arg5[%c0_15, %c0_16] : memref<32x1xf32, #tpu.memory_space<vmem>>, vector<32x1xf32>
      %17 = vector.broadcast %16 : vector<32x1xf32> to vector<32x50xf32>
      %18 = arith.addf %15, %17 : vector<32x50xf32>
      %cst_17 = arith.constant 0.000000e+00 : f32
      %19 = vector.broadcast %cst_17 : f32 to vector<32x50xf32>
      %20 = arith.maximumf %18, %19 : vector<32x50xf32>
      %c0_18 = arith.constant 0 : index
      %c0_19 = arith.constant 0 : index
      %21 = vector.load %arg6[%c0_18, %c0_19] : memref<32x50xf32, #tpu.memory_space<vmem>>, vector<32x50xf32>
      %22 = arith.mulf %20, %21 : vector<32x50xf32>
      %c0_20 = arith.constant 0 : index
      %c0_21 = arith.constant 0 : index
      %c0_22 = arith.constant 0 : index
      %23 = vector.load %arg7[%c0_20, %c0_21, %c0_22] : memref<1x32x50xf32, #tpu.memory_space<vmem>>, vector<1x32x50xf32>
      %24 = vector.shape_cast %23 : vector<1x32x50xf32> to vector<32x50xf32>
      %25 = vector.shape_cast %22 : vector<32x50xf32> to vector<1x32x50xf32>
      tpu.vector_store %arg7[%c0_20, %c0_21, %c0_22], %25 {strides = array<i32>} : memref<1x32x50xf32, #tpu.memory_space<vmem>>, vector<1x32x50xf32>,
    } else {
    }
    return
  }
  func.func @transform_0(%arg0: i32, %arg1: i32) -> (i32, i32, i32) {
    %c0_i32 = arith.constant 0 : i32
    %c0_i32_0 = arith.constant 0 : i32
    return %arg0, %c0_i32, %arg1 : i32, i32, i32
  }
  func.func @transform_1(%arg0: i32, %arg1: i32) -> (i32, i32) {
    %c0_i32 = arith.constant 0 : i32
    %c0_i32_0 = arith.constant 0 : i32
    return %arg1, %c0_i32 : i32, i32
  }
  func.func @transform_2(%arg0: i32, %arg1: i32) -> (i32, i32) {
    %c0_i32 = arith.constant 0 : i32
    %c0_i32_0 = arith.constant 0 : i32
    %c0_i32_1 = arith.constant 0 : i32
    return %c0_i32, %c0_i32_0 : i32, i32
  }
  func.func @transform_3(%arg0: i32, %arg1: i32) -> (i32, i32) {
    %c0_i32 = arith.constant 0 : i32
    %c0_i32_0 = arith.constant 0 : i32
    %c0_i32_1 = arith.constant 0 : i32
    return %c0_i32, %c0_i32_0 : i32, i32
  }
  func.func @transform_4(%arg0: i32, %arg1: i32) -> (i32, i32) {
    %c0_i32 = arith.constant 0 : i32
    %c0_i32_0 = arith.constant 0 : i32
    %c0_i32_1 = arith.constant 0 : i32
    return %c0_i32, %c0_i32_0 : i32, i32
  }
  func.func @transform_5(%arg0: i32, %arg1: i32) -> (i32, i32, i32) {
    %c0_i32 = arith.constant 0 : i32
    %c0_i32_0 = arith.constant 0 : i32
    %c0_i32_1 = arith.constant 0 : i32
    return %arg0, %c0_i32, %c0_i32_0 : i32, i32, i32
  }
}

</mosaic_0001>

<bundles_post_ra>
// kernel: tpu_custom_call.1
= control target key start
LH: loop header
LB: loop body
LE: loop exit
PB: predicated region body
PF: predicated region fallthrough
CT: control target
= control target key end

     0   :  { %10 = vsyncpa [#allocation4], 0  ;;  %s1132_s0 = inlined_call_operand.vmem [shape: f32[2,4,256], index: 0, kind: input, shape index: {}]   ;;  %s1133_s1 = inlined_call_operand.vmem [shape: f32[256,50], index: 1, kind: input, shape index: {}]   ;;  %s1134_s2 = inlined_call_operand.vmem [shape: f32[32,4], index: 2, kind: input, shape index: {}]   ;;  %s1135_s3 = inlined_call_operand.vmem [shape: f32[32,1], index: 3, kind: input, shape index: {}]   ;;  %s1136_s4 = inlined_call_operand.vmem [shape: f32[32,50], index: 4, kind: input, shape index: {}]   ;;  %s1137_s5 = inlined_call_operand.hbm [shape: f32[2,32,50], index: 5, kind: output, shape index: {}]  }
   0x1   :  { %12 = vsyncpa [#allocation4 + $0x1], 0  ;;  %s922_s18 = smov 0   ;;  %s924_s19 = smov 0  }
   0x2   :  { %s926_s20 = smov 0   ;;  %s928_s21 = smov 0  }
   0x3   :  { %s930_s22 = smov 0   ;;  %s932_s23 = smov 0  }
   0x4   :  { %s934_s24 = smov 0   ;;  %s936_s25 = smov 0  }
   0x5 LB: > { %1141 = sst [smem:[#allocation6_spill]] %s879_s24  ;;  %s622_s26 = sadd.s32 4294967295, %s883_s25   ;;  %s883_s25 = sphi %s936_s25, %s18_s25   ;;  %s879_s24 = sphi %s934_s24, %s1149_s24   ;;  %s875_s23 = sphi %s932_s23, %s1154_s23   ;;  %s871_s22 = sphi %s930_s22, %s1147_s22   ;;  %s867_s21 = sphi %s928_s21, %s1153_s21   ;;  %s863_s20 = sphi %s926_s20, %s1152_s20   ;;  %s859_s19 = sphi %s924_s19, %s1151_s19   ;;  %s855_s18 = sphi %s922_s18, %s1150_s18  }
   0x6   : > { %s623_s27 = sadd.s32 4294967294, %s883_s25   ;;  %s27_s28 = sadd.s32 1, %s875_s23 }
   0x7   : > { %p28_p0 = scmp.ge.s32.totalorder %s27_s28, 2  ;;  %s30_s29 = sadd.s32 1, %s879_s24 }
   0x8   : > { %p164_p1 = scmp.ne.s32.totalorder %s863_s20, %s859_s19  ;;  %p165_p2 = scmp.eq.s32.totalorder %s622_s26, 3 }
   0x9   : > { %s1156_s28 = smov (%p28_p0, %s27_s28), 0  ;;  %s1158_s29 = smov (!%p28_p0, %s30_s29), %s879_s24 }
   0xa   : > { %1142 = sst [smem:[#allocation7_spill]] %s1156_s28  ;;  %p971_p3 = por %p165_p2, %p164_p1 }
   0xb   : > { %p170_p4 = scmp.ne.s32.totalorder %s859_s19, %s855_s18  ;;  %p32_p5 = scmp.ge.s32.totalorder %s1158_s29, 2 }
   0xc   : > { %p171_p6 = scmp.eq.s32.totalorder %s623_s27, 3  ;;  %p626_p7 = scmp.ge.s32.totalorder %s883_s25, 1 }
   0xd   : > { %p218_p8 = scmp.lt.s32.totalorder %s883_s25, 5  ;;  %s1160_s29 = smov (%p32_p5, %s1158_s29), 0 }
   0xe   : > { %1144 = sst [smem:[#allocation8_spill]] %s1160_s29  ;;  %p981_p9 = por %p171_p6, %p170_p4 }
   0xf   : > { %p219_p10 = pnand %p626_p7, %p218_p8  ;;  %s151_s7 = ssub.s32 %s879_s24, %s1160_s29 }
  0x10   : > { %s154_s8 = sadd.s32 1, %s863_s20  ;;  %p152_p11 = scmp.eq.s32.totalorder %s151_s7, 0 }
  0x11   : > { %222 = sbr.rel (%p219_p10) target bundleno = 501 (0x1f5), region = 40  ;;  %s1140_s10 = sand.u32 (!%p219_p10), 1, %s859_s19  }
  0x12   : > { %s989_s9 = scalar_select %p152_p11, %s863_s20, %s154_s8  }
  0x13   : > { %p254_p12 = scmp.lt.s32.totalorder (!%p219_p10), %s871_s22, 1  ;;  %s627_s11 = sshll.u32 (!%p219_p10), %s1140_s10, 5 }
  0x14   : > { %p256_p13 = scmp.lt.s32.totalorder (!%p219_p10), %s867_s21, 1  ;;  %s630_s12 = sshll.u32 (!%p219_p10), %s867_s21, 4 }
  0x15   : > { %p263_p0 = scmp.lt.s32.totalorder (!%p219_p10), %s630_s12, 31  ;;  %s1009_s10 = scalar_lea.vmem (!%p219_p10), [#allocation3], %s627_s11 }
  0x16   : > { %s255_s13 = scalar_select %p254_p12, %s871_s22, 1 }
  0x17   : > { %s257_s14 = scalar_select %p256_p13, %s867_s21, 1 }
  0x18   : > { %s628_s15 = sshll.u32 %s255_s13, 1  ;;  %s1162_s12 = smov (!%p263_p0, %s630_s12), 31 }
  0x19   : > { %s259_s16 = sadd.s32 %s628_s15, %s257_s14  ;;  %s631_s8 = sshll.u32 %s1162_s12, 3 }
  0x1a   : > { %s629_s17 = sshll.u32 %s259_s16, 2  ;;  %s1007_s24 = scalar_lea.vmem %s1133_s1, %s631_s8 }
  0x1b   : > { %s1002_s7 = scalar_lea.vmem %s1132_s0, %s629_s17  ;;  %p632_p1 = scmp.ne.s32.totalorder %s867_s21, 0 }
  0x1d   : > { %271 = sbr.rel (%p632_p1) target bundleno = 36 (0x24), region = 44 }
  0x22   : > { %vm272_vm0 = vcmask 404480   ;;  %v885_v0 = vmov 0.0  }
  0x23   : > { %273 = vst.msk [vmem:[#allocation2] sm:$0xf] %vm272_vm0, %v885_v0 }
  0x24 PF: > { %v291_v1 = vld [vmem:[%s1007_s24 + $0x78] sm:$0xff]  ;;  %v886_v2 = vmov 0.0   ;;  %v290_v3 = vld [vmem:[%s1007_s24 + $0x70] sm:$0xff]  ;;  %vm887_vm1 = vmmov 0   ;;  %v289_v4 = vld [vmem:[%s1007_s24 + $0x68] sm:$0xff]  ;;  %vm363_vm2 = vcmask 404480  }
  0x25   : > { %667 = vmatprep.subr.mxu0 %v886_v2  ;;  %699 = vmatprep.mubr.msk.f32.mxu0 %vm887_vm1, %v886_v2  ;;  %v288_v5 = vld [vmem:[%s1007_s24 + $0x60] sm:$0xff]  ;;  %v287_v6 = vld [vmem:[%s1007_s24 + $0x58] sm:$0xff]  ;;  %v286_v7 = vld [vmem:[%s1007_s24 + $0x50] sm:$0xff]  ;;  %p633_p2 = scmp.ne.s32.totalorder %s867_s21, 1 }
  0x26   : > { %668 = vmatpush3.msra.mxu0 %v291_v1  ;;  %v285_v8 = vld [vmem:[%s1007_s24 + $0x48] sm:$0xff]  ;;  %v284_v9 = vld [vmem:[%s1007_s24 + $0x40] sm:$0xff]  ;;  %v283_v10 = vld [vmem:[%s1007_s24 + $0x38] sm:$0xff] }
  0x27   : > { %669 = vmatprep.subr.mxu0 %v886_v2  ;;  %v282_v11 = vld [vmem:[%s1007_s24 + $0x30] sm:$0xff]  ;;  %v281_v12 = vld [vmem:[%s1007_s24 + $0x28] sm:$0xff]  ;;  %v280_v13 = vld [vmem:[%s1007_s24 + $0x20] sm:$0xff] }
  0x28   : > { %670 = vmatpush3.msra.mxu0 %v290_v3  ;;  %v279_v14 = vld [vmem:[%s1007_s24 + $0x18] sm:$0xff]  ;;  %v278_v15 = vld [vmem:[%s1007_s24 + $0x10] sm:$0xff]  ;;  %v277_v16 = vld [vmem:[%s1007_s24 + $0x8] sm:$0xff] }
  0x29   : > { %671 = vmatprep.subr.mxu0 %v886_v2  ;;  %v276_v17 = vld [vmem:[%s1007_s24] sm:$0xff] }
  0x2a   : > { %672 = vmatpush3.msra.mxu0 %v289_v4  ;;  %v274_v18 = vld [vmem:[%s1002_s7] sm:$0xf] }
  0x2b   : > { %673 = vmatprep.subr.mxu0 %v886_v2  ;;  %v275_v19 = vld [vmem:[#allocation2] sm:$0xf] }
  0x2c   : > { %674 = vmatpush3.msra.mxu0 %v288_v5 }
  0x2d   : > { %675 = vmatprep.subr.mxu0 %v886_v2 }
  0x2e   : > { %676 = vmatpush3.msra.mxu0 %v287_v6 }
  0x2f   : > { %677 = vmatprep.subr.mxu0 %v886_v2 }
  0x30   : > { %678 = vmatpush3.msra.mxu0 %v286_v7 }
  0x31   : > { %679 = vmatprep.subr.mxu0 %v886_v2 }
  0x32   : > { %680 = vmatpush3.msra.mxu0 %v285_v8 }
  0x33   : > { %681 = vmatprep.subr.mxu0 %v886_v2 }
  0x34   : > { %682 = vmatpush3.msra.mxu0 %v284_v9 }
  0x35   : > { %683 = vmatprep.subr.mxu0 %v886_v2 }
  0x36   : > { %684 = vmatpush3.msra.mxu0 %v283_v10 }
  0x37   : > { %685 = vmatprep.subr.mxu0 %v886_v2 }
  0x38   : > { %686 = vmatpush3.msra.mxu0 %v282_v11 }
  0x39   : > { %687 = vmatprep.subr.mxu0 %v886_v2 }
  0x3a   : > { %688 = vmatpush3.msra.mxu0 %v281_v12 }
  0x3b   : > { %689 = vmatprep.subr.mxu0 %v886_v2 }
  0x3c   : > { %690 = vmatpush3.msra.mxu0 %v280_v13 }
  0x3d   : > { %691 = vmatprep.subr.mxu0 %v886_v2 }
  0x3e   : > { %692 = vmatpush3.msra.mxu0 %v279_v14 }
  0x3f   : > { %693 = vmatprep.subr.mxu0 %v886_v2 }
  0x40   : > { %694 = vmatpush3.msra.mxu0 %v278_v15 }
  0x41   : > { %695 = vmatprep.subr.mxu0 %v886_v2 }
  0x42   : > { %696 = vmatpush3.msra.mxu0 %v277_v16 }
  0x43   : > { %697 = vmatprep.subr.mxu0 %v886_v2 }
  0x44   : > { %698 = vmatpush3.msra.mxu0 %v276_v17 }
  0x45   : > { %700 = vmatmul.mubr.f32.vlgmr.msra.gmra.mxu0 %v274_v18 }
 0x104   : > { %368 = sbr.rel (%p633_p2) target bundleno = 476 (0x1dc), region = 48 }
 0x105   : > { %v358_v20 = vpop.f32.mrf.mxu0 }
 0x106   : > { %v362_v21 = vadd.f32 %v358_v20, %v275_v19 }
 0x107   : > { %v701_v22 = vpop.f32.mrf.mxu0 }
 0x108   : > { %364 = vst.msk [vmem:[#allocation2] sm:$0xf] %vm363_vm2, %v362_v21 }
 0x109   : > { %vm411_vm3 = vcmask 1043456   ;;  %v369_v24 = vld [vmem:[%s1134_s2] sm:$0xff]  ;;  %vm398_vm4 = vcmask 31744   ;;  %v371_v25 = vld [vmem:[%s1134_s2 + $0x10] sm:$0xff]  ;;  %v370_v26 = vld [vmem:[%s1134_s2 + $0x8] sm:$0xff]  ;;  %v888_v30 = vmov 0  }
 0x10a   : > { %v372_v27 = vld [vmem:[%s1134_s2 + $0x18] sm:$0xff]  ;;  %704 = vmatprep.mubr.msk.f32.mxu0 %vm398_vm4, %v369_v24  ;;  %707 = vmatprep.mubr.msk.f32.mxu1 %vm398_vm4, %v371_v25  ;;  %v376_v28 = vld [vmem:[%s1135_s3 + $0x10] sm:$0xff]  ;;  %v374_v29 = vld [vmem:[%s1135_s3] sm:$0xff]  ;;  %vm512_vm5 = vcmask 408576  }
 0x10b   : > { %790 = vset.pattern.permute.xlu1 %v888_v30  ;;  %789 = vset.pattern.permute.xlu0 %v888_v30  ;;  %v377_v31 = vld [vmem:[%s1135_s3 + $0x18] sm:$0xff]  ;;  %v375_v32 = vld [vmem:[%s1135_s3 + $0x8] sm:$0xff]  ;;  %v504_v49 = vld [vmem:[%s1136_s4] sm:$0xff] }
 0x10c   : > { %390 = vperm.xlu1 %790, %v376_v28   ;;  %380 = vperm.xlu0 %789, %v374_v29   ;;  %v505_v41 = vld [vmem:[%s1136_s4 + $0x8] sm:$0xff]  ;;  %v507_v42 = vld [vmem:[%s1136_s4 + $0x18] sm:$0xff]  ;;  %v506_v50 = vld [vmem:[%s1136_s4 + $0x10] sm:$0xff] }
 0x10f   : > { %v373_v23 = vld [vmem:[#allocation2] sm:$0xf] }
 0x110   : > { %702 = vmatprep.subr.msk.mxu0 %vm411_vm3, %v373_v23  ;;  %710 = vmatprep.subr.msk.mxu1 %vm411_vm3, %v373_v23 }
 0x111   : > { %703 = vmatpush3.msk.msra.mxu0 %vm411_vm3, %v373_v23  ;;  %711 = vmatpush3.msk.msra.mxu1 %vm411_vm3, %v373_v23 }
 0x112   : > { %705 = vmatmul.mubr.msk.f32.vlgmr.msra.gmra.mxu0 %vm398_vm4, %v370_v26  ;;  %708 = vmatmul.mubr.msk.f32.vlgmr.msra.gmra.mxu1 %vm398_vm4, %v372_v27 }
 0x113   : > { %395 = vperm.xlu1 %790, %v377_v31   ;;  %385 = vperm.xlu0 %789, %v375_v32  }
 0x187   : > { %v391_v33 = vpop.permute.xlu1 %390  ;;  %v381_v34 = vpop.permute.xlu0 %380 }
 0x18e   : > { %v396_v35 = vpop.permute.xlu1 %395  ;;  %v386_v36 = vpop.permute.xlu0 %385 }
 0x1d2   : > { %v706_v37 = vpop.f32.mrf.mxu0  ;;  %v709_v38 = vpop.f32.mrf.mxu1 }
 0x1d3   : > { %v487_v39 = vadd.f32 %v706_v37, %v386_v36  ;;  %v497_v40 = vadd.f32 %v709_v38, %v396_v35 }
 0x1d4   : > { %v481_v43 = vpop.f32.mrf.mxu0  ;;  %v491_v44 = vpop.f32.mrf.mxu1 }
 0x1d5   : > { %v501_v45 = vmax.f32 %v487_v39, 0.0  ;;  %v503_v46 = vmax.f32 %v497_v40, 0.0  ;;  %v482_v47 = vadd.f32 %v481_v43, %v381_v34  ;;  %v492_v48 = vadd.f32 %v491_v44, %v391_v33 }
 0x1d7   : > { %v509_v51 = vmul.f32 %v505_v41, %v501_v45  ;;  %v511_v52 = vmul.f32 %v507_v42, %v503_v46  ;;  %v500_v53 = vmax.f32 %v482_v47, 0.0  ;;  %v502_v54 = vmax.f32 %v492_v48, 0.0 }
 0x1d9   : > { %514 = vst.msk [vmem:[%s1009_s10 + $0x8] sm:$0xff] %vm512_vm5, %v509_v51  ;;  %516 = vst.msk [vmem:[%s1009_s10 + $0x18] sm:$0xff] %vm512_vm5, %v511_v52  ;;  %v508_v55 = vmul.f32 %v504_v49, %v500_v53  ;;  %v510_v56 = vmul.f32 %v506_v50, %v502_v54 }
 0x1db   : > { %513 = vst.msk [vmem:[%s1009_s10] sm:$0xff] %vm512_vm5, %v508_v55  ;;  %515 = vst.msk [vmem:[%s1009_s10 + $0x10] sm:$0xff] %vm512_vm5, %v510_v56 }
 0x1dc PF: > { %s644_s16 = sshll.u32 %s871_s22, 9  ;;  %s531_s7 = sshll.u32 %s1009_s10, 4  ;;  %s1077_s7 = int_to_ptr.vmem [resolvable:$true] %s531_s7 }
 0x1dd   : > { %s1074_s27 = scalar_lea.hbm %s1137_s5, %s644_s16  ;;  %s1146_s8 = sand.u32 1, %s859_s19  }
 0x1de   : > { %s1081_s28 = scalar_lea.sflag [#allocation4], %s1146_s8  ;;  %s791_s29 = scalar_lea.vmem %s1077_s7, 512 }
 0x1df   : > { %p792_p4 = scmp.ne.s32.totalorder %s1077_s7, %s791_s29  ;;  %s889_s22 = smov [#allocation3]  }
 0x1e0   : > { %s795_s24 = sshll.u32 %s889_s22, 4  ;;  %s796_s24 = int_to_ptr.vmem [resolvable:$false] %s795_s24 }
 0x1e1   : > { %p793_p5 = pnand %p792_p4, %p971_p3  ;;  %s797_s11 = scalar_lea.vmem %s796_s24, 1024 }
 0x1e2   : > { %p798_p7 = scmp.lt.s32.totalorder %s1077_s7, %s796_s24  ;;  %p799_p8 = scmp.lt.s32.totalorder %s797_s11, %s791_s29 }
 0x1e3   : > { %p794_p6 = pneg %p793_p5 }
 0x1e4   : > { %p800_p10 = por %p799_p8, %p798_p7 }
 0x1e6   : > { %p801_p11 = pnand %p800_p10, %p794_p6 }
 0x1e8   : > { %804 = shalt.err (!%p801_p11)
}
 0x1e9   : > { %s805_s10 = scalar_lea.hbm %s1074_s27, 512  ;;  %s809_s14 = scalar_lea.hbm %s1137_s5, 1024 }
 0x1ea   : > { %p806_p12 = scmp.ne.s32.totalorder %s1074_s27, %s805_s10  ;;  %p810_p1 = scmp.lt.s32.totalorder %s1074_s27, %s1137_s5 }
 0x1eb   : > { %p811_p2 = scmp.lt.s32.totalorder %s809_s14, %s805_s10 }
 0x1ec   : > { %p807_p13 = pnand %p806_p12, %p971_p3 }
 0x1ed   : > { %p812_p4 = por %p811_p2, %p810_p1 }
 0x1ee   : > { %p808_p0 = pneg %p807_p13 }
 0x1f0   : > { %p813_p5 = pnand %p812_p4, %p808_p0 }
 0x1f2   : > { %816 = shalt.err (!%p813_p5)
}
 0x1f3   : > { %s890_s16 = smov 128   ;;  %s891_s17 = smov 8  }
 0x1f4   : > { %712 = dma.vmem_to_hbm [thread:$0]  (%p971_p3), %s1077_s7, 512, %s1074_s27, %s1081_s28, %s890_s16, %s890_s16, %s891_s17  }
 0x1f5 PF: > { %p718_p6 = scmp.ge.s32.totalorder %s883_s25, 2  ;;  %s546_s26 = sand.u32 1, %s855_s18  }
 0x1f6   : > { %s547_s8 = scalar_lea.sflag [#allocation4], %s546_s26 }
 0x1f7   : > { %p715_p7 = pnand %p718_p6, %p981_p9 }
 0x1f9   : > { %p716_p8 = pneg %p715_p7 }
 0x1fb   : > { %850 = dma.done.wait (%p716_p8), %s547_s8, 512  }
 0x1fc   : > { %852 = vsyncadd (%p716_p8), %s547_s8, 4294966784  ;;  %s18_s25 = sadd.s32 1, %s883_s25   ;;  %s1147_s22 = sld [smem:[#allocation6_spill]] }
 0x1fd   : > { %p15_p10 = scmp.ge.s32.totalorder %s18_s25, 6   ;;  %s1148_s30 = sld [smem:[#allocation7_spill]] }
 0x1fe   : > { %s1149_s24 = sld [smem:[#allocation8_spill]]  ;;  %s1150_s18 = smov %s859_s19 }
 0x1ff   : > { %s1151_s19 = smov %s863_s20  ;;  %s1152_s20 = smov %s989_s9 }
 0x200   : > { %s1153_s21 = smov %s875_s23  ;;  %17 = sbr.rel (!%p15_p10) target bundleno = 5 (0x5), region = 86 }
 0x203   : > { %s1154_s23 = smov %s1148_s30 }
 0x205   :  { %552 = vsyncpa [#allocation4], 1 }
 0x206   :  { %554 = vsyncpa [#allocation4 + $0x1], 1 }

</bundles_post_ra>
